<compile_context>
chip_gen: v6e
topology: v6e:2x2x1
jax: 0.10.0
libtpu: 0.0.40
codegen_flags: <defaults>
</compile_context>

<pallas_src>
import functools

import jax
import jax.numpy as jnp
import numpy as np
from jax import lax
from jax.experimental import pallas as pl
from jax.experimental.pallas import tpu as pltpu


def _resblock_kernel(x_ref, w1_ref, b1_ref, w2_ref, b2_ref, m1_ref, out_ref, *, width):
    """One batch element per grid step.

    x_ref  : (1, C8, L0)   zero-embedded input, L0 = (H+2)*(W+2) + 4*PAD
    w*_ref : (C8, 9*C8)    packed conv weights (tap-major, channel-minor)
    b*_ref : (C8, 1)       biases
    m1_ref : (1, L1)       interior mask over the conv-1 output frame, L1 = L2 + 2*PAD
    out_ref: (1, C8, L2)   output in the padded-image frame, L2 = (H+2)*(W+2)
    """
    Wp = width + 2                     # padded row stride
    PAD = Wp + 1                       # max |tap shift| = one row + one column
    C8 = out_ref.shape[1]
    L2 = out_ref.shape[2]
    L1 = m1_ref.shape[1]
    shifts = tuple(dy * Wp + dx for dy in (-1, 0, 1) for dx in (-1, 0, 1))

    x0 = x_ref[0]                      # (C8, L0)
    m1 = m1_ref[...]                   # (1, L1)  1.0 on interior pixels, 0.0 elsewhere

    def conv3x3(a, wmat, bias, out_len):
        # 9 shifted taps = contiguous static lane slices of `a`; concatenate along the
        # (8-aligned) sublane axis and do a single MXU matmul with K = 9*C8.
        taps = [a[:, PAD + s: PAD + s + out_len] for s in shifts]
        patches = jnp.concatenate(taps, axis=0)                  # (9*C8, out_len)
        return jnp.dot(wmat, patches,
                       preferred_element_type=jnp.float32) + bias

    # First activation: ReLU of the embedded input (embedded zeros stay zero).
    a0 = jnp.maximum(x0, 0.0)

    # Conv #1 over the intermediate frame F1, then ReLU and re-zero the halo/slack so
    # the result is a correct zero-padded embedding for conv #2.
    h1 = conv3x3(a0, w1_ref[...], b1_ref[...], L1)               # (C8, L1)
    h1 = jnp.maximum(h1, 0.0) * m1

    # Conv #2 over the final padded-image frame F2.
    h2 = conv3x3(h1, w2_ref[...], b2_ref[...], L2)               # (C8, L2)

    identity = x0[:, 2 * PAD: 2 * PAD + L2]                      # pre-activation x
    out = h2 * m1[:, PAD: PAD + L2] + identity
    out_ref[0] = out.astype(out_ref.dtype)


@jax.jit
def resblock_pallas(x_nchw, w1, b1, w2, b2):
    """x_nchw: (B, C, H, W) float32 (PyTorch layout). Weights HWIO (3,3,C,C), biases (C,)."""
    B, C, H, W = x_nchw.shape
    Hp, Wp = H + 2, W + 2
    PAD = Wp + 1
    L2 = Hp * Wp                       # final frame (padded image, flattened)
    L1 = L2 + 2 * PAD                  # conv-1 output frame
    L0 = L2 + 4 * PAD                  # input frame (extra lane slack for tap slices)
    C8 = ((C + 7) // 8) * 8            # pad channels to a sublane multiple

    # Embed x: (B,C,H,W) -> zero-padded (B,C8,Hp,Wp) -> flat lanes -> lane slack.
    x_emb = jnp.pad(x_nchw, ((0, 0), (0, C8 - C), (1, 1), (1, 1)))
    x_emb = x_emb.reshape(B, C8, L2)
    x_emb = jnp.pad(x_emb, ((0, 0), (0, 0), (2 * PAD, 2 * PAD)))

    def pack(w, b):
        # HWIO (3,3,C,C) -> (C8, 9*C8), row o, column (ky*3+kx)*C8 + cin.
        w8 = jnp.zeros((3, 3, C8, C8), w.dtype).at[:, :, :C, :C].set(w)
        wmat = jnp.transpose(w8, (3, 0, 1, 2)).reshape(C8, 9 * C8)
        b8 = jnp.zeros((C8, 1), b.dtype).at[:C, 0].set(b)
        return wmat, b8

    w1m, b1c = pack(w1, b1)
    w2m, b2c = pack(w2, b2)

    # Interior mask over frame F1 (1.0 exactly at real image pixels).
    r = np.arange(L2)
    yy, xx = r // Wp, r % Wp
    interior = ((yy >= 1) & (yy <= H) & (xx >= 1) & (xx <= W)).astype(np.float32)
    m1_np = np.zeros((1, L1), np.float32)
    m1_np[0, PAD:PAD + L2] = interior
    m1 = jnp.asarray(m1_np)

    kernel = functools.partial(_resblock_kernel, width=W)
    out = pl.pallas_call(
        kernel,
        out_shape=jax.ShapeDtypeStruct((B, C8, L2), x_nchw.dtype),
        grid_spec=pltpu.PrefetchScalarGridSpec(
            num_scalar_prefetch=0,
            grid=(B,),
            in_specs=[
                pl.BlockSpec((1, C8, L0), lambda b: (b, 0, 0)),
                pl.BlockSpec((C8, 9 * C8), lambda b: (0, 0)),
                pl.BlockSpec((C8, 1), lambda b: (0, 0)),
                pl.BlockSpec((C8, 9 * C8), lambda b: (0, 0)),
                pl.BlockSpec((C8, 1), lambda b: (0, 0)),
                pl.BlockSpec((1, L1), lambda b: (0, 0)),
            ],
            out_specs=pl.BlockSpec((1, C8, L2), lambda b: (b, 0, 0)),
        ),
        compiler_params=pltpu.CompilerParams(dimension_semantics=("parallel",)),
    )(x_emb, w1m, b1c, w2m, b2c, m1)

    # Undo the lane-dense embedding: drop halo ring, channel padding, back to NCHW.
    return out.reshape(B, C8, Hp, Wp)[:, :C, 1:H + 1, 1:W + 1]


def resblock_reference(x_nchw, w1, b1, w2, b2):
    """Pure-JAX reference (matches PyTorch ResBlock with the default ReLU activation)."""
    C = x_nchw.shape[1]
    dn = lax.conv_dimension_numbers(x_nchw.shape, w1.shape, ('NCHW', 'HWIO', 'NCHW'))
    a = jnp.maximum(x_nchw, 0.0)
    h = lax.conv_general_dilated(a, w1, (1, 1), 'SAME', dimension_numbers=dn)
    h = h + b1.reshape(1, C, 1, 1)
    h = jnp.maximum(h, 0.0)
    h = lax.conv_general_dilated(h, w2, (1, 1), 'SAME', dimension_numbers=dn)
    h = h + b2.reshape(1, C, 1, 1)
    return h + x_nchw


if __name__ == "__main__":
    # Small shapes consistent with the module (input_ch == output_ch for the residual add).
    B, C, H, W = 2, 4, 16, 16
    key = jax.random.PRNGKey(0)
    kx, kw1, kb1, kw2, kb2 = jax.random.split(key, 5)

    x = jax.random.normal(kx, (B, C, H, W), dtype=jnp.float32)       # NCHW (PyTorch layout)

    # Conv2d(C, C, kernel_size=3)-style init, HWIO layout.
    fan_in = C * 3 * 3
    scale = 1.0 / np.sqrt(fan_in)
    w1 = jax.random.uniform(kw1, (3, 3, C, C), jnp.float32, -scale, scale)
    b1 = jax.random.uniform(kb1, (C,), jnp.float32, -scale, scale)
    w2 = jax.random.uniform(kw2, (3, 3, C, C), jnp.float32, -scale, scale)
    b2 = jax.random.uniform(kb2, (C,), jnp.float32, -scale, scale)

    # TODO(synk): ELU/Mish activation variants from EncoderConfig are not implemented
    # (kernel implements the default ReLU path).

    out = jax.block_until_ready(resblock_pallas(x, w1, b1, w2, b2))
    ref = resblock_reference(x, w1, b1, w2, b2)
    np.testing.assert_allclose(np.asarray(out), np.asarray(ref), rtol=1e-5, atol=1e-5)

    print("KERNEL_OK")
</pallas_src>

<mosaic_0001>
module attributes {stable_mosaic.version = 11 : i64} {
  func.func @_resblock_kernel(%arg0: i32, %arg1: memref<1x8x400xf32, #tpu.memory_space<vmem>>, %arg2: memref<8x72xf32, #tpu.memory_space<vmem>>, %arg3: memref<8x1xf32, #tpu.memory_space<vmem>>, %arg4: memref<8x72xf32, #tpu.memory_space<vmem>>, %arg5: memref<8x1xf32, #tpu.memory_space<vmem>>, %arg6: memref<1x362xf32, #tpu.memory_space<vmem>>, %arg7: memref<1x8x324xf32, #tpu.memory_space<vmem>>) attributes {dimension_semantics = [#tpu.dimension_semantics<parallel>], iteration_bounds = array<i64: 2>, scalar_prefetch = 0 : i64, scratch_operands = 0 : i64, tpu.core_type = #tpu.core_type<tc>, window_params = [{transform_indices = @transform_0, window_bounds = array<i64: 1, 8, 400>}, {pipeline_mode = #tpu.pipeline_mode<synchronous>, transform_indices = @transform_1, window_bounds = array<i64: 8, 72>}, {pipeline_mode = #tpu.pipeline_mode<synchronous>, transform_indices = @transform_2, window_bounds = array<i64: 8, 1>}, {pipeline_mode = #tpu.pipeline_mode<synchronous>, transform_indices = @transform_3, window_bounds = array<i64: 8, 72>}, {pipeline_mode = #tpu.pipeline_mode<synchronous>, transform_indices = @transform_4, window_bounds = array<i64: 8, 1>}, {pipeline_mode = #tpu.pipeline_mode<synchronous>, transform_indices = @transform_5, window_bounds = array<i64: 1, 362>}, {transform_indices = @transform_6, window_bounds = array<i64: 1, 8, 324>}]} {
    %c0 = arith.constant 0 : index
    %c0_0 = arith.constant 0 : index
    %c0_1 = arith.constant 0 : index
    %0 = vector.load %arg1[%c0, %c0_0, %c0_1] : memref<1x8x400xf32, #tpu.memory_space<vmem>>, vector<1x8x400xf32>
    %1 = vector.shape_cast %0 : vector<1x8x400xf32> to vector<8x400xf32>
    %c0_2 = arith.constant 0 : index
    %c0_3 = arith.constant 0 : index
    %2 = vector.load %arg6[%c0_2, %c0_3] : memref<1x362xf32, #tpu.memory_space<vmem>>, vector<1x362xf32>
    %cst = arith.constant 0.000000e+00 : f32
    %3 = vector.broadcast %cst : f32 to vector<8x400xf32>
    %4 = arith.maximumf %1, %3 : vector<8x400xf32>
    %c0_4 = arith.constant 0 : index
    %c0_5 = arith.constant 0 : index
    %5 = vector.load %arg2[%c0_4, %c0_5] : memref<8x72xf32, #tpu.memory_space<vmem>>, vector<8x72xf32>
    %c0_6 = arith.constant 0 : index
    %c0_7 = arith.constant 0 : index
    %6 = vector.load %arg3[%c0_6, %c0_7] : memref<8x1xf32, #tpu.memory_space<vmem>>, vector<8x1xf32>
    %7 = vector.extract_strided_slice %4 {offsets = [0, 0], sizes = [8, 362], strides = [1, 1]} : vector<8x400xf32> to vector<8x362xf32>
    %8 = vector.extract_strided_slice %4 {offsets = [0, 1], sizes = [8, 362], strides = [1, 1]} : vector<8x400xf32> to vector<8x362xf32>
    %9 = vector.extract_strided_slice %4 {offsets = [0, 2], sizes = [8, 362], strides = [1, 1]} : vector<8x400xf32> to vector<8x362xf32>
    %10 = vector.extract_strided_slice %4 {offsets = [0, 18], sizes = [8, 362], strides = [1, 1]} : vector<8x400xf32> to vector<8x362xf32>
    %11 = vector.extract_strided_slice %4 {offsets = [0, 19], sizes = [8, 362], strides = [1, 1]} : vector<8x400xf32> to vector<8x362xf32>
    %12 = vector.extract_strided_slice %4 {offsets = [0, 20], sizes = [8, 362], strides = [1, 1]} : vector<8x400xf32> to vector<8x362xf32>
    %13 = vector.extract_strided_slice %4 {offsets = [0, 36], sizes = [8, 362], strides = [1, 1]} : vector<8x400xf32> to vector<8x362xf32>
    %14 = vector.extract_strided_slice %4 {offsets = [0, 37], sizes = [8, 362], strides = [1, 1]} : vector<8x400xf32> to vector<8x362xf32>
    %15 = vector.extract_strided_slice %4 {offsets = [0, 38], sizes = [8, 362], strides = [1, 1]} : vector<8x400xf32> to vector<8x362xf32>
    %16 = tpu.concatenate %7, %8, %9, %10, %11, %12, %13, %14, %15 in 0 : vector<8x362xf32>, vector<8x362xf32>, vector<8x362xf32>, vector<8x362xf32>, vector<8x362xf32>, vector<8x362xf32>, vector<8x362xf32>, vector<8x362xf32>, vector<8x362xf32> -> vector<72x362xf32>
    %cst_8 = arith.constant dense<0.000000e+00> : vector<8x362xf32>
    %17 = tpu.matmul %5, %16, %cst_8 {dimension_numbers = #tpu.dot_dimension_numbers<[1], [0], [0], [1], [0, 0, 1, 1], [], []>} : vector<8x72xf32>, vector<72x362xf32>, vector<8x362xf32> -> vector<8x362xf32>
    %18 = vector.broadcast %6 : vector<8x1xf32> to vector<8x362xf32>
    %19 = arith.addf %17, %18 : vector<8x362xf32>
    %cst_9 = arith.constant 0.000000e+00 : f32
    %20 = vector.broadcast %cst_9 : f32 to vector<8x362xf32>
    %21 = arith.maximumf %19, %20 : vector<8x362xf32>
    %22 = vector.broadcast %2 : vector<1x362xf32> to vector<8x362xf32>
    %23 = arith.mulf %21, %22 : vector<8x362xf32>
    %c0_10 = arith.constant 0 : index
    %c0_11 = arith.constant 0 : index
    %24 = vector.load %arg4[%c0_10, %c0_11] : memref<8x72xf32, #tpu.memory_space<vmem>>, vector<8x72xf32>
    %c0_12 = arith.constant 0 : index
    %c0_13 = arith.constant 0 : index
    %25 = vector.load %arg5[%c0_12, %c0_13] : memref<8x1xf32, #tpu.memory_space<vmem>>, vector<8x1xf32>
    %26 = vector.extract_strided_slice %23 {offsets = [0, 0], sizes = [8, 324], strides = [1, 1]} : vector<8x362xf32> to vector<8x324xf32>
    %27 = vector.extract_strided_slice %23 {offsets = [0, 1], sizes = [8, 324], strides = [1, 1]} : vector<8x362xf32> to vector<8x324xf32>
    %28 = vector.extract_strided_slice %23 {offsets = [0, 2], sizes = [8, 324], strides = [1, 1]} : vector<8x362xf32> to vector<8x324xf32>
    %29 = vector.extract_strided_slice %23 {offsets = [0, 18], sizes = [8, 324], strides = [1, 1]} : vector<8x362xf32> to vector<8x324xf32>
    %30 = vector.extract_strided_slice %23 {offsets = [0, 19], sizes = [8, 324], strides = [1, 1]} : vector<8x362xf32> to vector<8x324xf32>
    %31 = vector.extract_strided_slice %23 {offsets = [0, 20], sizes = [8, 324], strides = [1, 1]} : vector<8x362xf32> to vector<8x324xf32>
    %32 = vector.extract_strided_slice %23 {offsets = [0, 36], sizes = [8, 324], strides = [1, 1]} : vector<8x362xf32> to vector<8x324xf32>
    %33 = vector.extract_strided_slice %23 {offsets = [0, 37], sizes = [8, 324], strides = [1, 1]} : vector<8x362xf32> to vector<8x324xf32>
    %34 = vector.extract_strided_slice %23 {offsets = [0, 38], sizes = [8, 324], strides = [1, 1]} : vector<8x362xf32> to vector<8x324xf32>
    %35 = tpu.concatenate %26, %27, %28, %29, %30, %31, %32, %33, %34 in 0 : vector<8x324xf32>, vector<8x324xf32>, vector<8x324xf32>, vector<8x324xf32>, vector<8x324xf32>, vector<8x324xf32>, vector<8x324xf32>, vector<8x324xf32>, vector<8x324xf32> -> vector<72x324xf32>
    %cst_14 = arith.constant dense<0.000000e+00> : vector<8x324xf32>
    %36 = tpu.matmul %24, %35, %cst_14 {dimension_numbers = #tpu.dot_dimension_numbers<[1], [0], [0], [1], [0, 0, 1, 1], [], []>} : vector<8x72xf32>, vector<72x324xf32>, vector<8x324xf32> -> vector<8x324xf32>
    %37 = vector.broadcast %25 : vector<8x1xf32> to vector<8x324xf32>
    %38 = arith.addf %36, %37 : vector<8x324xf32>
    %39 = vector.extract_strided_slice %1 {offsets = [0, 38], sizes = [8, 324], strides = [1, 1]} : vector<8x400xf32> to vector<8x324xf32>
    %40 = vector.extract_strided_slice %2 {offsets = [0, 19], sizes = [1, 324], strides = [1, 1]} : vector<1x362xf32> to vector<1x324xf32>
    %41 = vector.broadcast %40 : vector<1x324xf32> to vector<8x324xf32>
    %42 = arith.mulf %38, %41 : vector<8x324xf32>
    %43 = arith.addf %42, %39 : vector<8x324xf32>
    %c0_15 = arith.constant 0 : index
    %c0_16 = arith.constant 0 : index
    %c0_17 = arith.constant 0 : index
    %44 = vector.load %arg7[%c0_15, %c0_16, %c0_17] : memref<1x8x324xf32, #tpu.memory_space<vmem>>, vector<1x8x324xf32>
    %45 = vector.shape_cast %44 : vector<1x8x324xf32> to vector<8x324xf32>
    %46 = vector.shape_cast %43 : vector<8x324xf32> to vector<1x8x324xf32>
    tpu.vector_store %arg7[%c0_15, %c0_16, %c0_17], %46 {strides = array<i32>} : memref<1x8x324xf32, #tpu.memory_space<vmem>>, vector<1x8x324xf32>,
    return
  }
  func.func @transform_0(%arg0: i32) -> (i32, i32, i32) {
    %c0_i32 = arith.constant 0 : i32
    %c0_i32_0 = arith.constant 0 : i32
    %c0_i32_1 = arith.constant 0 : i32
    return %arg0, %c0_i32, %c0_i32_0 : i32, i32, i32
  }
  func.func @transform_1(%arg0: i32) -> (i32, i32) {
    %c0_i32 = arith.constant 0 : i32
    %c0_i32_0 = arith.constant 0 : i32
    %c0_i32_1 = arith.constant 0 : i32
    return %c0_i32, %c0_i32_0 : i32, i32
  }
  func.func @transform_2(%arg0: i32) -> (i32, i32) {
    %c0_i32 = arith.constant 0 : i32
    %c0_i32_0 = arith.constant 0 : i32
    %c0_i32_1 = arith.constant 0 : i32
    return %c0_i32, %c0_i32_0 : i32, i32
  }
  func.func @transform_3(%arg0: i32) -> (i32, i32) {
    %c0_i32 = arith.constant 0 : i32
    %c0_i32_0 = arith.constant 0 : i32
    %c0_i32_1 = arith.constant 0 : i32
    return %c0_i32, %c0_i32_0 : i32, i32
  }
  func.func @transform_4(%arg0: i32) -> (i32, i32) {
    %c0_i32 = arith.constant 0 : i32
    %c0_i32_0 = arith.constant 0 : i32
    %c0_i32_1 = arith.constant 0 : i32
    return %c0_i32, %c0_i32_0 : i32, i32
  }
  func.func @transform_5(%arg0: i32) -> (i32, i32) {
    %c0_i32 = arith.constant 0 : i32
    %c0_i32_0 = arith.constant 0 : i32
    %c0_i32_1 = arith.constant 0 : i32
    return %c0_i32, %c0_i32_0 : i32, i32
  }
  func.func @transform_6(%arg0: i32) -> (i32, i32, i32) {
    %c0_i32 = arith.constant 0 : i32
    %c0_i32_0 = arith.constant 0 : i32
    %c0_i32_1 = arith.constant 0 : i32
    return %arg0, %c0_i32, %c0_i32_0 : i32, i32, i32
  }
}

</mosaic_0001>

<bundles_post_ra>
// kernel: resblock_pallas.1
= control target key start
LH: loop header
LB: loop body
LE: loop exit
PB: predicated region body
PF: predicated region fallthrough
CT: control target
= control target key end

     0   :  { %s1029_s21 = smov 0   ;;  %s1267_s0 = inlined_call_operand.vmem [shape: f32[2,8,400], index: 0, kind: input, shape index: {}]   ;;  %s1268_s1 = inlined_call_operand.vmem [shape: f32[8,72], index: 1, kind: input, shape index: {}]   ;;  %s1269_s2 = inlined_call_operand.vmem [shape: f32[8,1], index: 2, kind: input, shape index: {}]   ;;  %s1270_s3 = inlined_call_operand.vmem [shape: f32[8,72], index: 3, kind: input, shape index: {}]   ;;  %s1271_s4 = inlined_call_operand.vmem [shape: f32[8,1], index: 4, kind: input, shape index: {}]   ;;  %s1272_s5 = inlined_call_operand.vmem [shape: f32[1,362], index: 5, kind: input, shape index: {}]   ;;  %s1273_s6 = inlined_call_operand.vmem [shape: f32[2,8,324], index: 6, kind: output, shape index: {}]  }
   0x1 LB: > { %s876_s22 = sadd.s32 4294967295, %s981_s21   ;;  %p880_p0 = scmp.ge.s32.totalorder %s981_s21, 1  ;;  %s981_s21 = sphi %s1029_s21, %s16_s21  }
   0x2   : > { %p212_p1 = scmp.lt.s32.totalorder %s981_s21, 3 }
   0x4   : > { %p213_p2 = pnand %p880_p0, %p212_p1 }
   0x5   : > { %p242_p3 = scmp.lt.s32.totalorder (!%p213_p2), %s876_s22, 1  ;;  %s984_s27 = smov (!%p213_p2), 90  }
   0x6   : > { %216 = sbr.rel (%p213_p2) target bundleno = 748 (0x2ec), region = 44  ;;  %s985_s28 = smov (!%p213_p2), 91  }
   0x7   : > { %s986_s29 = smov (!%p213_p2), 92   ;;  %s987_s30 = smov (!%p213_p2), 108  }
   0x8   : > { %s988_s7 = smov (!%p213_p2), 109   ;;  %s989_s8 = smov (!%p213_p2), 110  }
   0x9   : > { %s991_s9 = smov (!%p213_p2), 126   ;;  %s993_s10 = smov (!%p213_p2), 127  }
   0xb   : > { %s1275_s22 = smov (!%p242_p3, %s876_s22), 1  ;;  %v983_v5 = vmov 0.0   ;;  %vm990_vm0 = vmmov 0   ;;  %v992_v9 = vmov 0   ;;  %v262_v10 = vld [vmem:[%s1269_s2] sm:$0xff]  ;;  %vm365_vm1 = vcmask 736256  }
   0xc   : > { %s890_s23 = sshll.u32 %s1275_s22, 5  ;;  %911 = vmatprep.subr.mxu1 %v983_v5  ;;  %445 = vmatprep.mubr.f32.mxu0 %v983_v5  ;;  %vm350_vm2 = vcmask 744448   ;;  %vm335_vm3 = vcmask 752640   ;;  %vm320_vm4 = vcmask 883712   ;;  %vm308_vm5 = vcmask 891904   ;;  %v261_v55 = vld [vmem:[%s1268_s1] sm:$0xff] }
   0xd   : > { %s246_s26 = scalar_lea.vmem %s1267_s0, %s890_s23  ;;  %929 = vmatprep.mubr.msk.f32.mxu1 %vm990_vm0, %v983_v5  ;;  %973 = vset.pattern.permute.xlu1 %v992_v9  ;;  %vm296_vm6 = vcmask 900096   ;;  %vm284_vm7 = vcmask 1031168   ;;  %vm272_vm8 = vcmask 1039360   ;;  %vm377_vm9 = vcmask 588800   ;;  %v256_v61 = vld [vmem:[%s1272_s5] sm:$0x7] }
   0xe   : > { %v1043_v0 = vld [vmem:[%s246_s26 + $0x8] sm:$0xff]  ;;  %v1045_v1 = vld [vmem:[%s246_s26] sm:$0xff]  ;;  %v1047_v2 = vld [vmem:[%s246_s26 + $0x10] sm:$0xff]  ;;  %974 = vset.pattern.permute.xlu0 %v992_v9  ;;  %v526_v58 = vlaneseq  ;;  %s953_s23 = smul.u32 24, %s1275_s22  ;;  %vm819_vm10 = vcmask 556032  }
   0xf   : > { %v1050_v3 = vmax.f32 %v1043_v0, 0.0  ;;  %v1053_v4 = vmax.f32 %v1045_v1, 0.0  ;;  %v1062_v6 = vmax.f32 %v1047_v2, 0.0  ;;  %v255_v7 = vld [vmem:[%s246_s26 + $0x18] sm:$0xff] }
  0x10   : > { %v260_v8 = vmax.f32 %v255_v7, 0.0  ;;  %v527_v59 = vshrl.u32 %v526_v58, 7  ;;  %s251_s26 = scalar_lea.vmem %s1273_s6, %s953_s23 }
  0x11   : > { %359 = vrot.lane.b32.xlu0 %v1050_v3, %s984_s27  ;;  %357 = vrot.lane.b32.xlu1 %v1053_v4, %s984_s27 }
  0x12   : > { %v536_v60 = vsub.s32 2, %v527_v59 }
  0x15   : > { %361 = vrot.lane.b32.xlu0 %v1062_v6, %s984_s27  ;;  %344 = vrot.lane.b32.xlu1 %v1050_v3, %s985_s28 }
  0x19   : > { %346 = vrot.lane.b32.xlu0 %v1062_v6, %s985_s28  ;;  %342 = vrot.lane.b32.xlu1 %v1053_v4, %s985_s28 }
  0x1d   : > { %363 = vrot.lane.b32.xlu0 %v260_v8, %s984_s27  ;;  %329 = vrot.lane.b32.xlu1 %v1050_v3, %s986_s29 }
  0x21   : > { %331 = vrot.lane.b32.xlu0 %v1062_v6, %s986_s29  ;;  %327 = vrot.lane.b32.xlu1 %v1053_v4, %s986_s29 }
  0x25   : > { %348 = vrot.lane.b32.xlu0 %v260_v8, %s985_s28  ;;  %316 = vrot.lane.b32.xlu1 %v1050_v3, %s987_s30 }
  0x29   : > { %318 = vrot.lane.b32.xlu0 %v1062_v6, %s987_s30  ;;  %314 = vrot.lane.b32.xlu1 %v1053_v4, %s987_s30 }
  0x2d   : > { %333 = vrot.lane.b32.xlu0 %v260_v8, %s986_s29  ;;  %304 = vrot.lane.b32.xlu1 %v1050_v3, %s988_s7 }
  0x31   : > { %306 = vrot.lane.b32.xlu0 %v1062_v6, %s988_s7  ;;  %302 = vrot.lane.b32.xlu1 %v1053_v4, %s988_s7 }
  0x35   : > { %292 = vrot.lane.b32.xlu0 %v1050_v3, %s989_s8  ;;  %294 = vrot.lane.b32.xlu1 %v1062_v6, %s989_s8 }
  0x39   : > { %290 = vrot.lane.b32.xlu0 %v1053_v4, %s989_s8  ;;  %280 = vrot.lane.b32.xlu1 %v1050_v3, %s991_s9 }
  0x3d   : > { %282 = vrot.lane.b32.xlu0 %v1062_v6, %s991_s9  ;;  %278 = vrot.lane.b32.xlu1 %v1053_v4, %s991_s9 }
  0x41   : > { %268 = vrot.lane.b32.xlu0 %v1050_v3, %s993_s10  ;;  %270 = vrot.lane.b32.xlu1 %v1062_v6, %s993_s10 }
  0x45   : > { %266 = vrot.lane.b32.xlu0 %v1053_v4, %s993_s10  ;;  %374 = vperm.xlu1 %973, %v262_v10  }
  0x83   : > { %v360_v11 = vpop.permute.xlu0 %359  ;;  %v358_v12 = vpop.permute.xlu1 %357 }
  0x84   : > { %v366_v16 = vsel %vm365_vm1, %v358_v12, %v360_v11 }
  0x87   : > { %v362_v13 = vpop.permute.xlu0 %361  ;;  %v345_v14 = vpop.permute.xlu1 %344 }
  0x88   : > { %v367_v15 = vsel %vm365_vm1, %v360_v11, %v362_v13  ;;  %v528_v11 = vsub.s32 0, %v527_v59 }
  0x89   : > { %395 = vmatprep.subr.mxu0 %v367_v15 }
  0x8a   : > { %396 = vmatpush1.msra.mxu0 %v366_v16 }
  0x8b   : > { %v347_v17 = vpop.permute.xlu0 %346  ;;  %v343_v18 = vpop.permute.xlu1 %342 }
  0x8c   : > { %v352_v19 = vsel %vm350_vm2, %v345_v14, %v347_v17  ;;  %v351_v20 = vsel %vm350_vm2, %v343_v18, %v345_v14 }
  0x8d   : > { %397 = vmatprep.subr.mxu0 %v352_v19 }
  0x8e   : > { %398 = vmatpush1.msra.mxu0 %v351_v20 }
  0x8f   : > { %v364_v21 = vpop.permute.xlu0 %363  ;;  %v330_v22 = vpop.permute.xlu1 %329 }
  0x90   : > { %v368_v23 = vsel %vm365_vm1, %v362_v13, %v364_v21  ;;  %v529_v13 = vrot.slane %v256_v61, %v528_v11  ;;  %v545_v21 = vld [vmem:[%s1271_s4] sm:$0xff] }
  0x91   : > { %912 = vmatpush3.msra.mxu1 %v368_v23 }
  0x92   : > { %913 = vmatprep.subr.mxu1 %v983_v5 }
  0x93   : > { %v332_v24 = vpop.permute.xlu0 %331  ;;  %v328_v25 = vpop.permute.xlu1 %327 }
  0x94   : > { %v337_v26 = vsel %vm335_vm3, %v330_v22, %v332_v24  ;;  %v336_v27 = vsel %vm335_vm3, %v328_v25, %v330_v22 }
  0x95   : > { %399 = vmatprep.subr.mxu0 %v337_v26 }
  0x96   : > { %400 = vmatpush1.msra.mxu0 %v336_v27 }
  0x97   : > { %v349_v28 = vpop.permute.xlu0 %348  ;;  %v317_v29 = vpop.permute.xlu1 %316 }
  0x98   : > { %v353_v30 = vsel %vm350_vm2, %v347_v17, %v349_v28  ;;  %v532_v17 = vsub.s32 1, %v527_v59  ;;  %v544_v59 = vld [vmem:[%s1270_s3] sm:$0xff] }
  0x99   : > { %914 = vmatpush3.msra.mxu1 %v353_v30 }
  0x9a   : > { %915 = vmatprep.subr.mxu1 %v983_v5  ;;  %v533_v19 = vrot.slane %v256_v61, %v532_v17 }
  0x9b   : > { %v319_v31 = vpop.permute.xlu0 %318  ;;  %v315_v32 = vpop.permute.xlu1 %314 }
  0x9c   : > { %v322_v33 = vsel %vm320_vm4, %v317_v29, %v319_v31  ;;  %v321_v34 = vsel %vm320_vm4, %v315_v32, %v317_v29 }
  0x9d   : > { %401 = vmatprep.subr.mxu0 %v322_v33 }
  0x9e   : > { %402 = vmatpush1.msra.mxu0 %v321_v34 }
  0x9f   : > { %v334_v35 = vpop.permute.xlu0 %333  ;;  %v305_v36 = vpop.permute.xlu1 %304 }
  0xa0   : > { %v338_v37 = vsel %vm335_vm3, %v332_v24, %v334_v35 }
  0xa1   : > { %916 = vmatpush3.msra.mxu1 %v338_v37 }
  0xa2   : > { %917 = vmatprep.subr.mxu1 %v983_v5 }
  0xa3   : > { %918 = vmatpush3.msra.mxu1 %v319_v31  ;;  %v307_v38 = vpop.permute.xlu0 %306  ;;  %v303_v39 = vpop.permute.xlu1 %302 }
  0xa4   : > { %v310_v40 = vsel %vm308_vm5, %v305_v36, %v307_v38  ;;  %919 = vmatprep.subr.mxu1 %v983_v5  ;;  %v309_v41 = vsel %vm308_vm5, %v303_v39, %v305_v36 }
  0xa5   : > { %403 = vmatprep.subr.mxu0 %v310_v40  ;;  %920 = vmatpush3.msra.mxu1 %v307_v38 }
  0xa6   : > { %404 = vmatpush1.msra.mxu0 %v309_v41  ;;  %921 = vmatprep.subr.mxu1 %v983_v5 }
  0xa7   : > { %v293_v42 = vpop.permute.xlu0 %292  ;;  %v295_v43 = vpop.permute.xlu1 %294 }
  0xa8   : > { %922 = vmatpush3.msra.mxu1 %v295_v43  ;;  %v298_v44 = vsel %vm296_vm6, %v293_v42, %v295_v43 }
  0xa9   : > { %405 = vmatprep.subr.mxu0 %v298_v44  ;;  %923 = vmatprep.subr.mxu1 %v983_v5 }
  0xab   : > { %v291_v45 = vpop.permute.xlu0 %290  ;;  %v281_v46 = vpop.permute.xlu1 %280 }
  0xac   : > { %v297_v47 = vsel %vm296_vm6, %v291_v45, %v293_v42 }
  0xad   : > { %406 = vmatpush1.msra.mxu0 %v297_v47 }
  0xaf   : > { %v283_v48 = vpop.permute.xlu0 %282  ;;  %v279_v49 = vpop.permute.xlu1 %278 }
  0xb0   : > { %v286_v50 = vsel %vm284_vm7, %v281_v46, %v283_v48  ;;  %v285_v51 = vsel %vm284_vm7, %v279_v49, %v281_v46  ;;  %924 = vmatpush3.msra.mxu1 %v283_v48 }
  0xb1   : > { %407 = vmatprep.subr.mxu0 %v286_v50  ;;  %925 = vmatprep.subr.mxu1 %v983_v5 }
  0xb2   : > { %408 = vmatpush1.msra.mxu0 %v285_v51 }
  0xb3   : > { %v269_v52 = vpop.permute.xlu0 %268  ;;  %v271_v53 = vpop.permute.xlu1 %270 }
  0xb4   : > { %926 = vmatpush3.msra.mxu1 %v271_v53  ;;  %v274_v54 = vsel %vm272_vm8, %v269_v52, %v271_v53 }
  0xb5   : > { %409 = vmatprep.subr.mxu0 %v274_v54  ;;  %927 = vmatprep.subr.mxu1 %v983_v5 }
  0xb6   : > { %928 = vmatpush3.msra.mxu1 %v1062_v6  ;;  %v537_v6 = vrot.slane %v256_v61, %v536_v60 }
  0xb7   : > { %v267_v56 = vpop.permute.xlu0 %266  ;;  %930 = vmatmul.mubr.msk.f32.vlgmr.msra.gmra.mxu1 %vm377_vm9, %v261_v55  ;;  %932 = vmatprep.subr.mxu1 %v983_v5 }
  0xb8   : > { %v273_v57 = vsel %vm272_vm8, %v267_v56, %v269_v52  ;;  %950 = vmatprep.mubr.msk.f32.mxu1 %vm990_vm0, %v983_v5 }
  0xb9   : > { %410 = vmatpush1.msra.mxu0 %v273_v57 }
  0xba   : > { %411 = vmatprep.subr.mxu0 %v1050_v3 }
  0xbb   : > { %412 = vmatpush1.msra.mxu0 %v1053_v4 }
  0xbc   : > { %884 = vmatmul.mubr.msk.f32.vlgmr.msra.gmra.mxu0 %vm377_vm9, %v261_v55 }
  0xbd   : > { %709 = vmatprep.mubr.f32.mxu0 %v983_v5 }
  0xc0   : > { %v375_v62 = vpop.permute.xlu1 %374 }
 0x177   : > { %v518_v63 = vpop.f32.mrf.mxu1 }
 0x178   : > { %v519_v7 = vadd.f32 %v518_v63, %v375_v62 }
 0x179   : > { %v931_v8 = vpop.f32.mrf.mxu1 }
 0x17a   : > { %v524_v9 = vmax.f32 %v519_v7, 0.0 }
 0x17c   : > { %v1158_v3 = vmul.f32 %v537_v6, %v524_v9  ;;  %v447_v4 = vpop.f32.mrf.mxu0 }
 0x17d   : > { %v448_v10 = vadd.f32 %v447_v4, %v375_v62 }
 0x17e   : > { %619 = vrot.lane.b32.xlu0 %v1158_v3, %s985_s28  ;;  %630 = vrot.lane.b32.xlu1 %v1158_v3, %s984_s27  ;;  %v449_v15 = vpop.f32.mrf.mxu0 }
 0x17f   : > { %v522_v12 = vmax.f32 %v448_v10, 0.0  ;;  %v450_v16 = vadd.f32 %v449_v15, %v375_v62 }
 0x181   : > { %v1172_v14 = vmul.f32 %v529_v13, %v522_v12  ;;  %v523_v18 = vmax.f32 %v450_v16, 0.0 }
 0x182   : > { %597 = vrot.lane.b32.xlu0 %v1158_v3, %s987_s30  ;;  %608 = vrot.lane.b32.xlu1 %v1158_v3, %s986_s29 }
 0x183   : > { %v1190_v20 = vmul.f32 %v533_v19, %v523_v18 }
 0x186   : > { %575 = vrot.lane.b32.xlu0 %v1158_v3, %s989_s8  ;;  %586 = vrot.lane.b32.xlu1 %v1158_v3, %s988_s7 }
 0x18a   : > { %564 = vrot.lane.b32.xlu1 %v1158_v3, %s991_s9  ;;  %626 = vrot.lane.b32.xlu0 %v1172_v14, %s984_s27 }
 0x18e   : > { %615 = vrot.lane.b32.xlu1 %v1172_v14, %s985_s28  ;;  %604 = vrot.lane.b32.xlu0 %v1172_v14, %s986_s29 }
 0x192   : > { %593 = vrot.lane.b32.xlu1 %v1172_v14, %s987_s30  ;;  %582 = vrot.lane.b32.xlu0 %v1172_v14, %s988_s7 }
 0x196   : > { %571 = vrot.lane.b32.xlu1 %v1172_v14, %s989_s8  ;;  %560 = vrot.lane.b32.xlu0 %v1172_v14, %s991_s9 }
 0x19a   : > { %617 = vrot.lane.b32.xlu1 %v1190_v20, %s985_s28  ;;  %628 = vrot.lane.b32.xlu0 %v1190_v20, %s984_s27 }
 0x19e   : > { %595 = vrot.lane.b32.xlu1 %v1190_v20, %s987_s30  ;;  %606 = vrot.lane.b32.xlu0 %v1190_v20, %s986_s29 }
 0x1a2   : > { %573 = vrot.lane.b32.xlu1 %v1190_v20, %s989_s8  ;;  %584 = vrot.lane.b32.xlu0 %v1190_v20, %s988_s7 }
 0x1a6   : > { %551 = vrot.lane.b32.xlu1 %v1190_v20, %s993_s10  ;;  %562 = vrot.lane.b32.xlu0 %v1190_v20, %s991_s9 }
 0x1aa   : > { %549 = vrot.lane.b32.xlu1 %v1172_v14, %s993_s10  ;;  %553 = vrot.lane.b32.xlu0 %v1158_v3, %s993_s10 }
 0x1ae   : > { %639 = vperm.xlu0 %974, %v545_v21   ;;  %786 = vrot.lane.b32.xlu1 %v529_v13, %s988_s7 }
 0x1b2   : > { %788 = vrot.lane.b32.xlu1 %v533_v19, %s988_s7  ;;  %790 = vrot.lane.b32.xlu0 %v537_v6, %s988_s7 }
 0x1b6   : > { %803 = vrot.lane.b32.xlu1 %v1045_v1, %s984_s27  ;;  %805 = vrot.lane.b32.xlu0 %v1043_v0, %s984_s27 }
 0x1ba   : > { %807 = vrot.lane.b32.xlu1 %v1047_v2, %s984_s27 }
 0x1f0   : > { %v620_v22 = vpop.permute.xlu0 %619  ;;  %v631_v23 = vpop.permute.xlu1 %630 }
 0x1f1   : > { %933 = vmatpush3.msra.mxu1 %v631_v23 }
 0x1f2   : > { %934 = vmatprep.subr.mxu1 %v983_v5 }
 0x1f3   : > { %935 = vmatpush3.msra.mxu1 %v620_v22 }
 0x1f4   : > { %v598_v24 = vpop.permute.xlu0 %597  ;;  %936 = vmatprep.subr.mxu1 %v983_v5  ;;  %v609_v25 = vpop.permute.xlu1 %608 }
 0x1f5   : > { %937 = vmatpush3.msra.mxu1 %v609_v25 }
 0x1f6   : > { %938 = vmatprep.subr.mxu1 %v983_v5 }
 0x1f7   : > { %939 = vmatpush3.msra.mxu1 %v598_v24 }
 0x1f8   : > { %v576_v1 = vpop.permute.xlu0 %575  ;;  %940 = vmatprep.subr.mxu1 %v983_v5  ;;  %v587_v0 = vpop.permute.xlu1 %586 }
 0x1f9   : > { %941 = vmatpush3.msra.mxu1 %v587_v0 }
 0x1fa   : > { %942 = vmatprep.subr.mxu1 %v983_v5 }
 0x1fb   : > { %943 = vmatpush3.msra.mxu1 %v576_v1 }
 0x1fc   : > { %944 = vmatprep.subr.mxu1 %v983_v5  ;;  %v565_v2 = vpop.permute.xlu1 %564  ;;  %v627_v26 = vpop.permute.xlu0 %626 }
 0x1fd   : > { %945 = vmatpush3.msra.mxu1 %v565_v2 }
 0x1fe   : > { %946 = vmatprep.subr.mxu1 %v983_v5 }
 0x200   : > { %v616_v27 = vpop.permute.xlu1 %615  ;;  %v605_v28 = vpop.permute.xlu0 %604 }
 0x204   : > { %v594_v29 = vpop.permute.xlu1 %593  ;;  %v583_v30 = vpop.permute.xlu0 %582 }
 0x208   : > { %v572_v31 = vpop.permute.xlu1 %571  ;;  %v561_v32 = vpop.permute.xlu0 %560 }
 0x20c   : > { %v618_v33 = vpop.permute.xlu1 %617  ;;  %v629_v34 = vpop.permute.xlu0 %628 }
 0x20d   : > { %v632_v35 = vsel %vm365_vm1, %v627_v26, %v629_v34  ;;  %v633_v36 = vsel %vm365_vm1, %v629_v34, %v631_v23  ;;  %v622_v37 = vsel %vm350_vm2, %v618_v33, %v620_v22  ;;  %v621_v38 = vsel %vm350_vm2, %v616_v27, %v618_v33 }
 0x20e   : > { %659 = vmatprep.subr.mxu0 %v633_v36 }
 0x20f   : > { %660 = vmatpush1.msra.mxu0 %v632_v35 }
 0x210   : > { %v596_v39 = vpop.permute.xlu1 %595  ;;  %661 = vmatprep.subr.mxu0 %v622_v37  ;;  %v607_v40 = vpop.permute.xlu0 %606 }
 0x211   : > { %v610_v41 = vsel %vm335_vm3, %v605_v28, %v607_v40  ;;  %662 = vmatpush1.msra.mxu0 %v621_v38  ;;  %v611_v42 = vsel %vm335_vm3, %v607_v40, %v609_v25  ;;  %v600_v43 = vsel %vm320_vm4, %v596_v39, %v598_v24  ;;  %v599_v44 = vsel %vm320_vm4, %v594_v29, %v596_v39 }
 0x212   : > { %663 = vmatprep.subr.mxu0 %v611_v42 }
 0x213   : > { %664 = vmatpush1.msra.mxu0 %v610_v41 }
 0x214   : > { %v574_v45 = vpop.permute.xlu1 %573  ;;  %665 = vmatprep.subr.mxu0 %v600_v43  ;;  %v585_v46 = vpop.permute.xlu0 %584 }
 0x215   : > { %v588_v47 = vsel %vm308_vm5, %v583_v30, %v585_v46  ;;  %666 = vmatpush1.msra.mxu0 %v599_v44  ;;  %v589_v48 = vsel %vm308_vm5, %v585_v46, %v587_v0  ;;  %v578_v49 = vsel %vm296_vm6, %v574_v45, %v576_v1  ;;  %v577_v50 = vsel %vm296_vm6, %v572_v31, %v574_v45 }
 0x216   : > { %667 = vmatprep.subr.mxu0 %v589_v48 }
 0x217   : > { %668 = vmatpush1.msra.mxu0 %v588_v47 }
 0x218   : > { %v552_v51 = vpop.permute.xlu1 %551  ;;  %669 = vmatprep.subr.mxu0 %v578_v49  ;;  %v563_v52 = vpop.permute.xlu0 %562 }
 0x219   : > { %v566_v53 = vsel %vm284_vm7, %v561_v32, %v563_v52  ;;  %670 = vmatpush1.msra.mxu0 %v577_v50  ;;  %v567_v54 = vsel %vm284_vm7, %v563_v52, %v565_v2 }
 0x21a   : > { %671 = vmatprep.subr.mxu0 %v567_v54 }
 0x21b   : > { %672 = vmatpush1.msra.mxu0 %v566_v53 }
 0x21c   : > { %v550_v55 = vpop.permute.xlu1 %549  ;;  %v554_v56 = vpop.permute.xlu0 %553 }
 0x21d   : > { %v555_v57 = vsel %vm272_vm8, %v550_v55, %v552_v51  ;;  %947 = vmatpush3.msra.mxu1 %v554_v56  ;;  %v556_v58 = vsel %vm272_vm8, %v552_v51, %v554_v56 }
 0x21e   : > { %673 = vmatprep.subr.mxu0 %v556_v58  ;;  %948 = vmatprep.subr.mxu1 %v983_v5 }
 0x21f   : > { %674 = vmatpush1.msra.mxu0 %v555_v57  ;;  %949 = vmatpush3.msra.mxu1 %v1158_v3 }
 0x220   : > { %675 = vmatprep.subr.mxu0 %v1190_v20  ;;  %951 = vmatmul.mubr.msk.f32.vlgmr.msra.gmra.mxu1 %vm377_vm9, %v544_v59  ;;  %v787_v60 = vpop.permute.xlu1 %786 }
 0x221   : > { %676 = vmatpush1.msra.mxu0 %v1172_v14 }
 0x222   : > { %886 = vmatmul.mubr.msk.f32.vlgmr.msra.gmra.mxu0 %vm377_vm9, %v544_v59 }
 0x224   : > { %v789_v61 = vpop.permute.xlu1 %788 }
 0x225   : > { %v792_v12 = vsel %vm308_vm5, %v787_v60, %v789_v61 }
 0x228   : > { %v804_v63 = vpop.permute.xlu1 %803 }
 0x229   : > { %v640_v62 = vpop.permute.xlu0 %639 }
 0x22c   : > { %v808_v5 = vpop.permute.xlu1 %807 }
 0x22d   : > { %v791_v6 = vpop.permute.xlu0 %790 }
 0x22e   : > { %v793_v17 = vsel %vm308_vm5, %v789_v61, %v791_v6 }
 0x231   : > { %v806_v10 = vpop.permute.xlu0 %805 }
 0x232   : > { %v809_v18 = vsel %vm365_vm1, %v804_v63, %v806_v10  ;;  %v810_v19 = vsel %vm365_vm1, %v806_v10, %v808_v5 }
 0x2e0   : > { %v782_v7 = vpop.f32.mrf.mxu1 }
 0x2e1   : > { %v783_v8 = vadd.f32 %v782_v7, %v640_v62 }
 0x2e2   : > { %v711_v9 = vpop.f32.mrf.mxu0  ;;  %v952_v4 = vpop.f32.mrf.mxu1 }
 0x2e3   : > { %v712_v3 = vadd.f32 %v711_v9, %v640_v62  ;;  %v799_v11 = vmul.f32 %v791_v6, %v783_v8 }
 0x2e4   : > { %v713_v13 = vpop.f32.mrf.mxu0 }
 0x2e5   : > { %v797_v14 = vmul.f32 %v792_v12, %v712_v3  ;;  %v816_v15 = vadd.f32 %v808_v5, %v799_v11  ;;  %v714_v16 = vadd.f32 %v713_v13, %v640_v62 }
 0x2e7   : > { %v814_v20 = vadd.f32 %v809_v18, %v797_v14  ;;  %820 = vst.msk [vmem:[%s251_s26 + $0x10] sm:$0xff] %vm819_vm10, %v816_v15  ;;  %v798_v21 = vmul.f32 %v793_v17, %v714_v16 }
 0x2e9   : > { %817 = vst [vmem:[%s251_s26] sm:$0xff] %v814_v20  ;;  %v815_v22 = vadd.f32 %v810_v19, %v798_v21 }
 0x2eb   : > { %818 = vst [vmem:[%s251_s26 + $0x8] sm:$0xff] %v815_v22 }
 0x2ec PF: > { %s16_s21 = sadd.s32 1, %s981_s21  }
 0x2ed   : > { %p13_p4 = scmp.ge.s32.totalorder %s16_s21, 4  }
 0x2ef   :  { %15 = sbr.rel (!%p13_p4) target bundleno = 1 (0x1), region = 74 }

</bundles_post_ra>
